<compile_context>
chip_gen: v7x
topology: tpu7x:2x2x1
jax: 0.10.0
libtpu: 0.0.40
codegen_flags: <defaults>
</compile_context>

<pallas_src>
import jax
import jax.numpy as jnp
from jax.experimental import pallas as pl
from jax.experimental.pallas import tpu as pltpu

LANE = 128          # vreg lane width
BF16_SUBLANE = 16   # bf16 rows per vreg (sublane pack)


def _round_up(n, m):
    return ((n + m - 1) // m) * m


def _pad_axis(a, axis, mult):
    """Zero-pad array `a` along `axis` up to the next multiple of `mult`."""
    size = a.shape[axis]
    pad = (-size) % mult
    if pad == 0:
        return a
    widths = [(0, 0)] * a.ndim
    widths[axis] = (0, pad)
    return jnp.pad(a, widths)


def ffn_kernel(x_ref, w1_ref, b1_ref, w2_ref, b2_ref, o_ref):
    out_cols = o_ref.shape[-1]                       # real OUT (=2), static
    # hidden = relu(x @ W1 + b1); x cast to MXU operand dtype in-register.
    x = x_ref[...].astype(w1_ref.dtype)
    h = jnp.dot(x, w1_ref[...], preferred_element_type=jnp.float32)
    h = jnp.maximum(h + b1_ref[...], 0.0)            # f32 bias add + ReLU
    # out = hidden @ W2 + b2; W2 is lane-padded, only the real cols stored.
    o = jnp.dot(h.astype(w2_ref.dtype), w2_ref[...],
                preferred_element_type=jnp.float32)
    o_ref[...] = (o[:, :out_cols] + b2_ref[...]).astype(o_ref.dtype)


def prepare_ffn_params(w1, b1, w2, b2, *, compute_dtype=jnp.bfloat16):
    """One-time padding + casts (hoisted out of the per-call forward).

    w1: [C, H], b1: [1, H], w2: [H, OUT], b2: [1, OUT].
    Hidden / W2 columns are zero-padded to LANE multiples; this is exact:
    padded hidden columns are relu(0 + 0) = 0 and meet zero W2 rows.
    """
    w1p = _pad_axis(w1, 1, LANE).astype(compute_dtype)                      # [C,  Hp]
    b1p = _pad_axis(b1, 1, LANE).astype(jnp.float32)                        # [1,  Hp]
    w2p = _pad_axis(_pad_axis(w2, 0, LANE), 1, LANE).astype(compute_dtype)  # [Hp, OUTp]
    b2p = b2.astype(jnp.float32)                                            # [1,  OUT]
    return w1p, b1p, w2p, b2p


def ffn_forward(x, params, *, block_rows=512):
    """x: [B, C] (native dtype), params from prepare_ffn_params -> [B, OUT]."""
    w1p, b1p, w2p, b2p = params
    B, C = x.shape
    Cw, Hp = w1p.shape
    OUTp = w2p.shape[1]
    OUT = b2p.shape[1]
    assert Cw == C, "in_channel mismatch between x and prepared params"
    out_dtype = x.dtype

    # Batch tile: one full-dim block when B is small, else a bf16-sublane
    # aligned tile.  No batch padding -- Pallas masks the partial last block.
    if B <= block_rows:
        TB = B
    else:
        TB = _round_up(min(block_rows, B), BF16_SUBLANE)
    grid = (pl.cdiv(B, TB),)

    # Explicit scoped-VMEM budget (v5e default is only 16 MiB).
    itemsz = lambda a: a.size * a.dtype.itemsize
    resident = itemsz(w1p) + itemsz(b1p) + itemsz(w2p) + itemsz(b2p)
    per_step = (2 * TB * C * x.dtype.itemsize                     # x tile (x2 buffers)
                + 2 * TB * OUT * jnp.dtype(out_dtype).itemsize    # out tile (x2 buffers)
                + 2 * TB * Hp * 4                                 # f32 hidden + bf16 copy
                + TB * OUTp * 4)                                  # f32 second-matmul result
    vmem_limit = int(min(max(4 * (resident + per_step), 16 * 1024 * 1024),
                         48 * 1024 * 1024))

    cost = pl.CostEstimate(
        flops=2 * B * C * Hp + 2 * B * Hp * OUTp,
        transcendentals=0,
        bytes_accessed=int(itemsz(x) + resident
                           + B * OUT * jnp.dtype(out_dtype).itemsize),
    )

    def resident_spec(shape):
        # Constant index_map -> stays VMEM-resident across all grid steps;
        # single-buffered so it doesn't pay the default double-buffer cost.
        return pl.BlockSpec(shape, lambda i: (0, 0), pipeline_mode=pl.Buffered(1))

    # TODO(synk): if C/hidden grow so the resident bf16 weights approach
    # ~12-16 MiB (v7x: 64 MiB physical / 32 MiB default scoped VMEM), add a
    # hidden-slab grid axis (acc += relu(x @ W1[:, k] + b1[k]) @ W2[k, :])
    # with a VMEM f32 accumulator and dimension_semantics ("parallel",
    # "arbitrary"), and pad contraction/hidden dims toward 256 multiples for
    # v6e/v7x's 256x256 MXU.
    out = pl.pallas_call(
        ffn_kernel,
        out_shape=jax.ShapeDtypeStruct((B, OUT), out_dtype),
        grid=grid,
        in_specs=[
            pl.BlockSpec((TB, C), lambda i: (i, 0)),   # x tile, double-buffered
            resident_spec((C, Hp)),                    # W1 resident
            resident_spec((1, Hp)),                    # b1 resident
            resident_spec((Hp, OUTp)),                 # W2 resident
            resident_spec((1, OUT)),                   # b2 resident
        ],
        out_specs=pl.BlockSpec((TB, OUT), lambda i: (i, 0)),
        compiler_params=pltpu.CompilerParams(
            dimension_semantics=("parallel",),
            vmem_limit_bytes=vmem_limit),
        cost_estimate=cost,
    )(x, w1p, b1p, w2p, b2p)

    return out


def init_ffn_params(key, in_channel, hidden):
    """Deterministic init mimicking nn.Linear's uniform(-1/sqrt(fan_in)) ranges."""
    k1, k2, k3, k4 = jax.random.split(key, 4)
    bound1 = 1.0 / jnp.sqrt(in_channel)
    bound2 = 1.0 / jnp.sqrt(hidden)
    # Stored already transposed ([in, out]) relative to PyTorch's [out, in].
    w1 = jax.random.uniform(k1, (in_channel, hidden), jnp.float32, -bound1, bound1)
    b1 = jax.random.uniform(k2, (1, hidden), jnp.float32, -bound1, bound1)
    w2 = jax.random.uniform(k3, (hidden, 2), jnp.float32, -bound2, bound2)
    b2 = jax.random.uniform(k4, (1, 2), jnp.float32, -bound2, bound2)
    return w1, b1, w2, b2


if __name__ == "__main__":
    in_channel = 16
    hidden = 32
    batch = 8

    key = jax.random.PRNGKey(0)
    kx, kp = jax.random.split(key)
    x = jax.random.normal(kx, (batch, in_channel), jnp.float32)
    w1, b1, w2, b2 = init_ffn_params(kp, in_channel, hidden)

    # Plain-JAX reference (same math as the PyTorch module).
    ref = jnp.maximum(x @ w1 + b1, 0.0) @ w2 + b2

    # One-time weight prep (pad + cast hoisted out of the forward pass).
    params = prepare_ffn_params(w1, b1, w2, b2)

    out = jax.block_until_ready(ffn_forward(x, params))
    assert out.shape == (batch, 2)
    assert jnp.allclose(out, ref, atol=5e-2, rtol=5e-2), "bf16 kernel mismatch"

    print("KERNEL_OK")
</pallas_src>

<mosaic_0001>
module attributes {stable_mosaic.version = 11 : i64} {
  func.func @ffn_kernel(%arg0: i32, %arg1: memref<8x16xf32, #tpu.memory_space<vmem>>, %arg2: memref<16x128xbf16, #tpu.memory_space<vmem>>, %arg3: memref<1x128xf32, #tpu.memory_space<vmem>>, %arg4: memref<128x128xbf16, #tpu.memory_space<vmem>>, %arg5: memref<1x2xf32, #tpu.memory_space<vmem>>, %arg6: memref<8x2xf32, #tpu.memory_space<vmem>>) attributes {dimension_semantics = [#tpu.dimension_semantics<parallel>], iteration_bounds = array<i64: 1>, scalar_prefetch = 0 : i64, scratch_operands = 0 : i64, tpu.core_type = #tpu.core_type<tc>, window_params = [{transform_indices = @transform_0, window_bounds = array<i64: 8, 16>}, {pipeline_mode = #tpu.pipeline_mode<synchronous>, transform_indices = @transform_1, window_bounds = array<i64: 16, 128>}, {pipeline_mode = #tpu.pipeline_mode<synchronous>, transform_indices = @transform_2, window_bounds = array<i64: 1, 128>}, {pipeline_mode = #tpu.pipeline_mode<synchronous>, transform_indices = @transform_3, window_bounds = array<i64: 128, 128>}, {pipeline_mode = #tpu.pipeline_mode<synchronous>, transform_indices = @transform_4, window_bounds = array<i64: 1, 2>}, {transform_indices = @transform_5, window_bounds = array<i64: 8, 2>}]} {
    %c0 = arith.constant 0 : index
    %c0_0 = arith.constant 0 : index
    %0 = vector.load %arg1[%c0, %c0_0] : memref<8x16xf32, #tpu.memory_space<vmem>>, vector<8x16xf32>
    %1 = arith.truncf %0 : vector<8x16xf32> to vector<8x16xbf16>
    %c0_1 = arith.constant 0 : index
    %c0_2 = arith.constant 0 : index
    %2 = vector.load %arg2[%c0_1, %c0_2] : memref<16x128xbf16, #tpu.memory_space<vmem>>, vector<16x128xbf16>
    %cst = arith.constant dense<0.000000e+00> : vector<8x128xf32>
    %3 = tpu.matmul %1, %2, %cst {dimension_numbers = #tpu.dot_dimension_numbers<[1], [0], [0], [1], [0, 0, 1, 1], [], []>} : vector<8x16xbf16>, vector<16x128xbf16>, vector<8x128xf32> -> vector<8x128xf32>
    %c0_3 = arith.constant 0 : index
    %c0_4 = arith.constant 0 : index
    %4 = vector.load %arg3[%c0_3, %c0_4] : memref<1x128xf32, #tpu.memory_space<vmem>>, vector<1x128xf32>
    %5 = vector.broadcast %4 : vector<1x128xf32> to vector<8x128xf32>
    %6 = arith.addf %3, %5 : vector<8x128xf32>
    %cst_5 = arith.constant 0.000000e+00 : f32
    %7 = vector.broadcast %cst_5 : f32 to vector<8x128xf32>
    %8 = arith.maximumf %6, %7 : vector<8x128xf32>
    %9 = arith.truncf %8 : vector<8x128xf32> to vector<8x128xbf16>
    %c0_6 = arith.constant 0 : index
    %c0_7 = arith.constant 0 : index
    %10 = vector.load %arg4[%c0_6, %c0_7] : memref<128x128xbf16, #tpu.memory_space<vmem>>, vector<128x128xbf16>
    %cst_8 = arith.constant dense<0.000000e+00> : vector<8x128xf32>
    %11 = tpu.matmul %9, %10, %cst_8 {dimension_numbers = #tpu.dot_dimension_numbers<[1], [0], [0], [1], [0, 0, 1, 1], [], []>} : vector<8x128xbf16>, vector<128x128xbf16>, vector<8x128xf32> -> vector<8x128xf32>
    %12 = vector.extract_strided_slice %11 {offsets = [0, 0], sizes = [8, 2], strides = [1, 1]} : vector<8x128xf32> to vector<8x2xf32>
    %c0_9 = arith.constant 0 : index
    %c0_10 = arith.constant 0 : index
    %13 = vector.load %arg5[%c0_9, %c0_10] : memref<1x2xf32, #tpu.memory_space<vmem>>, vector<1x2xf32>
    %14 = vector.broadcast %13 : vector<1x2xf32> to vector<8x2xf32>
    %15 = arith.addf %12, %14 : vector<8x2xf32>
    %c0_11 = arith.constant 0 : index
    %c0_12 = arith.constant 0 : index
    %16 = vector.load %arg6[%c0_11, %c0_12] : memref<8x2xf32, #tpu.memory_space<vmem>>, vector<8x2xf32>
    tpu.vector_store %arg6[%c0_11, %c0_12], %15 {strides = array<i32>} : memref<8x2xf32, #tpu.memory_space<vmem>>, vector<8x2xf32>,
    return
  }
  func.func @transform_0(%arg0: i32) -> (i32, i32) {
    %c0_i32 = arith.constant 0 : i32
    %c0_i32_0 = arith.constant 0 : i32
    return %arg0, %c0_i32 : i32, i32
  }
  func.func @transform_1(%arg0: i32) -> (i32, i32) {
    %c0_i32 = arith.constant 0 : i32
    %c0_i32_0 = arith.constant 0 : i32
    %c0_i32_1 = arith.constant 0 : i32
    return %c0_i32, %c0_i32_0 : i32, i32
  }
  func.func @transform_2(%arg0: i32) -> (i32, i32) {
    %c0_i32 = arith.constant 0 : i32
    %c0_i32_0 = arith.constant 0 : i32
    %c0_i32_1 = arith.constant 0 : i32
    return %c0_i32, %c0_i32_0 : i32, i32
  }
  func.func @transform_3(%arg0: i32) -> (i32, i32) {
    %c0_i32 = arith.constant 0 : i32
    %c0_i32_0 = arith.constant 0 : i32
    %c0_i32_1 = arith.constant 0 : i32
    return %c0_i32, %c0_i32_0 : i32, i32
  }
  func.func @transform_4(%arg0: i32) -> (i32, i32) {
    %c0_i32 = arith.constant 0 : i32
    %c0_i32_0 = arith.constant 0 : i32
    %c0_i32_1 = arith.constant 0 : i32
    return %c0_i32, %c0_i32_0 : i32, i32
  }
  func.func @transform_5(%arg0: i32) -> (i32, i32) {
    %c0_i32 = arith.constant 0 : i32
    %c0_i32_0 = arith.constant 0 : i32
    return %arg0, %c0_i32 : i32, i32
  }
}

</mosaic_0001>

<bundles_post_ra>
// kernel: tpu_custom_call.1
= control target key start
LH: loop header
LB: loop body
LE: loop exit
PB: predicated region body
PF: predicated region fallthrough
CT: control target
= control target key end

     0   :  { %10 = vsyncpa [#allocation3], 0  ;;  %s466_s0 = inlined_call_operand.hbm [shape: f32[8,16], index: 0, kind: input, shape index: {}]   ;;  %s467_s1 = inlined_call_operand.hbm [shape: bf16[16,128], index: 1, kind: input, shape index: {}]   ;;  %s468_s2 = inlined_call_operand.vmem [shape: f32[1,128], index: 2, kind: input, shape index: {}]   ;;  %s469_s3 = inlined_call_operand.hbm [shape: bf16[128,128], index: 3, kind: input, shape index: {}]   ;;  %s470_s4 = inlined_call_operand.vmem [shape: f32[1,2], index: 4, kind: input, shape index: {}]   ;;  %s471_s5 = inlined_call_operand.vmem [shape: f32[8,2], index: 5, kind: output, shape index: {}]  }
   0x1   :  { %11 = vsyncpa [#allocation5], 0  ;;  %s378_s18 = smov [#allocation4]   ;;  %s308_s22 = scalar_lea.hbm %s467_s1, 128 }
   0x2   :  { %s27_s19 = sshll.u32 %s378_s18, 4  ;;  %p309_p0 = scmp.ne.s32.totalorder %s467_s1, %s308_s22  ;;  %s28_s19 = int_to_ptr.vmem [resolvable:$true] %s27_s19 }
   0x3   :  { %p312_p1 = scmp.lt.u32.totalorder %s308_s22, %s467_s1 }
   0x5   :  { %p314_p2 = pnand %p312_p1, %p309_p0 }
   0x7   :  { %317 = shalt.err (!%p314_p2)
}
   0x8   :  { %s318_s27 = scalar_lea.vmem %s28_s19, 128  ;;  %p323_p4 = scmp.lt.s32.totalorder %s28_s19, %s28_s19 }
   0x9   :  { %p319_p3 = scmp.ne.s32.totalorder %s28_s19, %s318_s27  ;;  %p324_p5 = scmp.lt.s32.totalorder %s318_s27, %s318_s27 }
   0xb   :  { %p325_p6 = por %p324_p5, %p323_p4 }
   0xd   :  { %p326_p7 = pnand %p325_p6, %p319_p3 }
   0xf   :  { %329 = shalt.err (!%p326_p7)
}
  0x10   :  { %s379_s28 = smov 64   ;;  %s380_s29 = smov 4  }
  0x11   :  { %33 = dma.hbm_to_vmem [thread:$0]  %s467_s1, 128, %s28_s19, [#allocation5], %s379_s28, %s379_s28, %s380_s29  }
  0x12   :  { %s381_s7 = smov [#allocation2]   ;;  %s382_s9 = smov [#allocation6]  }
  0x13   :  { %s18_s8 = sshll.u32 %s381_s7, 4  ;;  %s41_s10 = sshll.u32 %s382_s9, 4  ;;  %s19_s8 = int_to_ptr.vmem [resolvable:$true] %s18_s8  ;;  %s42_s10 = int_to_ptr.vmem [resolvable:$true] %s41_s10 }
  0x14   :  { %s330_s13 = scalar_lea.hbm %s466_s0, 128 }
  0x15   :  { %p331_p8 = scmp.ne.s32.totalorder %s466_s0, %s330_s13  ;;  %p334_p9 = scmp.lt.u32.totalorder %s330_s13, %s466_s0 }
  0x17   :  { %p336_p10 = pnand %p334_p9, %p331_p8 }
  0x19   :  { %339 = shalt.err (!%p336_p10)
}
  0x1a   :  { %s340_s1 = scalar_lea.vmem %s19_s8, 128  ;;  %p345_p12 = scmp.lt.s32.totalorder %s19_s8, %s19_s8 }
  0x1b   :  { %p341_p11 = scmp.ne.s32.totalorder %s19_s8, %s340_s1  ;;  %p346_p13 = scmp.lt.s32.totalorder %s340_s1, %s340_s1 }
  0x1d   :  { %p347_p0 = por %p346_p13, %p345_p12 }
  0x1f   :  { %p348_p1 = pnand %p347_p0, %p341_p11 }
  0x21   :  { %351 = shalt.err (!%p348_p1)
}
  0x22   :  { %21 = dma.hbm_to_vmem [thread:$0]  %s466_s0, 128, %s19_s8, [#allocation3]  }
  0x23   :  { %s352_s22 = scalar_lea.hbm %s469_s3, 1024 }
  0x24   :  { %p353_p2 = scmp.ne.s32.totalorder %s469_s3, %s352_s22  ;;  %p356_p3 = scmp.lt.u32.totalorder %s352_s22, %s469_s3 }
  0x26   :  { %p358_p4 = pnand %p356_p3, %p353_p2 }
  0x28   :  { %361 = shalt.err (!%p358_p4)
}
  0x29   :  { %s362_s27 = scalar_lea.vmem %s42_s10, 1024  ;;  %p367_p6 = scmp.lt.s32.totalorder %s42_s10, %s42_s10 }
  0x2a   :  { %p363_p5 = scmp.ne.s32.totalorder %s42_s10, %s362_s27  ;;  %p368_p7 = scmp.lt.s32.totalorder %s362_s27, %s362_s27 }
  0x2c   :  { %p369_p8 = por %p368_p7, %p367_p6 }
  0x2e   :  { %p370_p9 = pnand %p369_p8, %p363_p5 }
  0x30   :  { %373 = shalt.err (!%p370_p9)
}
  0x31   :  { %47 = dma.hbm_to_vmem [thread:$0]  %s469_s3, 1024, %s42_s10, [#allocation5], %s379_s28, %s379_s28, %s380_s29  }
  0x32   :  { %374 = dma.done.wait [#allocation3], 128  }
  0x33   :  { %375 = vsyncadd [#allocation3], 4294967168 }
  0x34   :  { %376 = dma.done.wait [#allocation5], 1152  }
  0x35   :  { %377 = vsyncadd [#allocation5], 4294966144  ;;  %v383_v0 = vmov 0.0   ;;  %vm384_vm0 = vmmov 0   ;;  %v299_v1 = vld [vmem:[#allocation4] sm:$0xff]   ;;  %v60_v2 = vld [vmem:[#allocation2] sm:$0xff] }
  0x36   :  { %266 = vmatprep.subr.bf16.mxu0 %v383_v0  ;;  %268 = vmatprep.mubr.msk.bf16.mxu0 %vm384_vm0, %v383_v0  ;;  %v61_v3 = vpack.c.bf16 %v60_v2, %v60_v2  ;;  %vm77_vm1 = vcmask 130048   ;;  %v300_v4 = vld [vmem:[#allocation6] sm:$0xff]   ;;  %v301_v5 = vld [vmem:[#allocation6 + $0x8] sm:$0xff]   ;;  %v302_v6 = vld [vmem:[#allocation6 + $0x10] sm:$0xff]   ;;  %vm235_vm2 = vcmask 15360  }
  0x37   :  { %272 = vmatprep.subr.bf16.mxu1 %v383_v0  ;;  %288 = vmatprep.mubr.msk.bf16.mxu1 %vm384_vm0, %v383_v0  ;;  %v303_v7 = vld [vmem:[#allocation6 + $0x18] sm:$0xff]   ;;  %v304_v8 = vld [vmem:[#allocation6 + $0x20] sm:$0xff]   ;;  %v305_v9 = vld [vmem:[#allocation6 + $0x28] sm:$0xff]  }
  0x38   :  { %267 = vmatpush3.bf16.msra.mxu0 %v299_v1  ;;  %273 = vmatpush3.bf16.msra.mxu1 %v300_v4  ;;  %v306_v10 = vld [vmem:[#allocation6 + $0x30] sm:$0xff]   ;;  %v307_v11 = vld [vmem:[#allocation6 + $0x38] sm:$0xff]  }
  0x39   :  { %274 = vmatprep.subr.bf16.mxu1 %v383_v0  ;;  %v243_v12 = vld [vmem:[%s468_s2] ss:$0 sm:$0xff] }
  0x3a   :  { %v254_v20 = vld [vmem:[%s470_s4] ss:$0 sm:$0xff] }
  0x3b   :  { %269 = vmatmul.mubr.msk.bf16.vlgmr.msra.gmra.mrb[0].mxu0 %vm77_vm1, %v61_v3 }
  0x3c   :  { %275 = vmatpush3.bf16.msra.mxu1 %v301_v5 }
  0x3d   :  { %276 = vmatprep.subr.bf16.mxu1 %v383_v0 }
  0x40   :  { %277 = vmatpush3.bf16.msra.mxu1 %v302_v6 }
  0x41   :  { %278 = vmatprep.subr.bf16.mxu1 %v383_v0 }
  0x44   :  { %279 = vmatpush3.bf16.msra.mxu1 %v303_v7 }
  0x45   :  { %280 = vmatprep.subr.bf16.mxu1 %v383_v0 }
  0x48   :  { %281 = vmatpush3.bf16.msra.mxu1 %v304_v8 }
  0x49   :  { %282 = vmatprep.subr.bf16.mxu1 %v383_v0 }
  0x4c   :  { %283 = vmatpush3.bf16.msra.mxu1 %v305_v9 }
  0x4d   :  { %284 = vmatprep.subr.bf16.mxu1 %v383_v0 }
  0x50   :  { %285 = vmatpush3.bf16.msra.mxu1 %v306_v10 }
  0x51   :  { %286 = vmatprep.subr.bf16.mxu1 %v383_v0 }
  0x54   :  { %287 = vmatpush3.bf16.msra.mxu1 %v307_v11 }
 0x10e   :  { %v115_v13 = vpop.f32.mrb[0].mxu0 }
 0x10f   :  { %v116_v14 = vadd.f32 %v243_v12, %v115_v13  ;;  %v270_v15 = vpop.f32.mrb[1].mxu0 }
 0x110   :  { %v118_v16 = vpop.f32.mrb[2].mxu0 }
 0x111   :  { %v121_v17 = vmax.f32 %v116_v14, 0.0  ;;  %v271_v18 = vpop.f32.mrb[3].mxu0 }
 0x113   :  { %v122_v19 = vpack.c.bf16 %v121_v17, %v121_v17 }
 0x115   :  { %289 = vmatmul.mubr.bf16.vlgmr.msra.gmra.mrb[0].mxu1 %v122_v19 }
 0x1e8   :  { %v221_v21 = vpop.f32.mrb[0].mxu1 }
 0x1e9   :  { %v234_v22 = vadd.f32 %v254_v20, %v221_v21  ;;  %v290_v23 = vpop.f32.mrb[1].mxu1 }
 0x1ea   :  { %v224_v24 = vpop.f32.mrb[2].mxu1 }
 0x1eb   :  { %236 = vst.msk [vmem:[%s471_s5] sm:$0xff] %vm235_vm2, %v234_v22  ;;  %v291_v25 = vpop.f32.mrb[3].mxu1 }
 0x1ec   :  { %241 = vsyncpa [#allocation3], 1 }
 0x1ed   :  { %242 = vsyncpa [#allocation5], 1 }

</bundles_post_ra>
